<compile_context>
chip_gen: v7x
topology: tpu7x:2x2x1
jax: 0.10.0
libtpu: 0.0.40
codegen_flags: <defaults>
</compile_context>

<pallas_src>
import functools

import numpy as np

import jax
import jax.numpy as jnp
from jax.experimental import pallas as pl
from jax.experimental.pallas import tpu as pltpu

_LANE = 128
_SUBLANE = 8
_NUM_CORE_SPLITS = 2      # megacore-friendly split; harmless on 1-TC chips
_LANE_TILE_CAP = 32768


def _round_up(x, m):
    return ((x + m - 1) // m) * m


def _cdiv(a, b):
    return (a + b - 1) // b


def _vmem_budgets():
    """(vmem_limit_bytes, per-tile f32 intermediate budget) per generation."""
    try:
        cap = int(pltpu.get_tpu_info().vmem_capacity_bytes)
    except Exception:
        cap = 64 * 1024 * 1024                      # conservative (v7x-like)
    if cap >= 128 * 1024 * 1024:                    # v5e / v6e
        return 48 * 1024 * 1024, 6 * 1024 * 1024
    return 32 * 1024 * 1024, 2 * 1024 * 1024        # v7x (64 MiB VMEM / TC)


def _focal_factor(one_minus_p, gamma):
    """(1 - p)^gamma with cheap VPU paths for the common integer gammas."""
    g = float(gamma)
    if g == 2.0:
        return one_minus_p * one_minus_p
    if g == 1.0:
        return one_minus_p
    if g == 0.0:
        return jnp.ones_like(one_minus_p)
    return jnp.power(one_minus_p, jnp.float32(g))


# ---------------------------------------------------------------------------
# Kernels
# ---------------------------------------------------------------------------
def _focal_loss_kernel_lane(*refs, gamma, n_total, tile_n, tiles_per_core,
                            alpha_scalar):
    """Lane-dense layout: classes on sublanes, batch rows on lanes (small C)."""
    if alpha_scalar is None:
        xT_ref, t_ref, a_ref, out_ref = refs
    else:
        xT_ref, t_ref, out_ref = refs
        a_ref = None

    p = pl.program_id(0)           # core split ("parallel")
    i = pl.program_id(1)           # reduction step ("arbitrary")

    x = xT_ref[...].astype(jnp.float32)          # (C, Tn)
    t = t_ref[...]                               # (1, Tn) int32 class ids
    c, tn = x.shape

    # stable log-softmax pieces over the class (sublane) axis
    m = jnp.max(x, axis=0, keepdims=True)                     # (1, Tn)
    denom = jnp.sum(jnp.exp(x - m), axis=0, keepdims=True)    # (1, Tn)

    # one-hot "scatter_" replacement: class iota vs target id
    cls = jax.lax.broadcasted_iota(jnp.int32, (c, tn), 0)
    mask = (cls == t).astype(jnp.float32)                     # (C, Tn)

    x_t = jnp.sum(x * mask, axis=0, keepdims=True)            # (1, Tn)
    log_p = (x_t - m) - jnp.log(denom)                        # (1, Tn)
    probs = jnp.exp(log_p)
    focal = _focal_factor(1.0 - probs, gamma)

    if alpha_scalar is None:
        a = a_ref[...].astype(jnp.float32)                    # (C, 1)
        alpha_t = jnp.sum(a * mask, axis=0, keepdims=True)    # (1, Tn)
        batch_loss = -alpha_t * focal * log_p
    else:
        batch_loss = (-float(alpha_scalar)) * focal * log_p

    # mask padded rows (padding is zeros, so post-exp masking is safe)
    lane = jax.lax.broadcasted_iota(jnp.int32, (1, tn), 1)
    base = (p * tiles_per_core + i) * tile_n
    valid = ((base + lane) < n_total).astype(jnp.float32)
    tile_sum = jnp.sum(batch_loss * valid)

    @pl.when(i == 0)
    def _():
        out_ref[...] = jnp.zeros_like(out_ref)

    out_ref[...] += tile_sum.reshape(1, 1, 1)


def _focal_loss_kernel_row(*refs, gamma, n_total, tile_n, tiles_per_core,
                           alpha_scalar):
    """Row-major layout: batch rows on sublanes, classes on lanes (wide C)."""
    if alpha_scalar is None:
        x_ref, t_ref, a_ref, out_ref = refs
    else:
        x_ref, t_ref, out_ref = refs
        a_ref = None

    p = pl.program_id(0)
    i = pl.program_id(1)

    x = x_ref[...].astype(jnp.float32)           # (Tn, C)
    t = t_ref[...]                               # (Tn, 1) int32 class ids
    tn, c = x.shape

    m = jnp.max(x, axis=1, keepdims=True)                     # (Tn, 1)
    denom = jnp.sum(jnp.exp(x - m), axis=1, keepdims=True)    # (Tn, 1)

    cls = jax.lax.broadcasted_iota(jnp.int32, (tn, c), 1)
    mask = (cls == t).astype(jnp.float32)                     # (Tn, C)

    x_t = jnp.sum(x * mask, axis=1, keepdims=True)            # (Tn, 1)
    log_p = (x_t - m) - jnp.log(denom)                        # (Tn, 1)
    probs = jnp.exp(log_p)
    focal = _focal_factor(1.0 - probs, gamma)

    if alpha_scalar is None:
        a = a_ref[...].astype(jnp.float32)                    # (1, C)
        alpha_t = jnp.sum(a * mask, axis=1, keepdims=True)    # (Tn, 1)
        batch_loss = -alpha_t * focal * log_p
    else:
        batch_loss = (-float(alpha_scalar)) * focal * log_p

    row = jax.lax.broadcasted_iota(jnp.int32, (tn, 1), 0)
    base = (p * tiles_per_core + i) * tile_n
    valid = ((base + row) < n_total).astype(jnp.float32)
    tile_sum = jnp.sum(batch_loss * valid)

    @pl.when(i == 0)
    def _():
        out_ref[...] = jnp.zeros_like(out_ref)

    out_ref[...] += tile_sum.reshape(1, 1, 1)


# ---------------------------------------------------------------------------
# Wrapper
# ---------------------------------------------------------------------------
def focal_loss(logits, targets, alpha=None, gamma=2.0, size_average=True):
    """Pallas TPU implementation of FocalLoss.forward.

    logits:  (N, C) float array (any float dtype; kernel computes in f32)
    targets: (N,)   int class indices
    alpha:   None / scalar / (C,) / (C, 1); None -> ones (torch.ones(C, 1))
    """
    n, c = logits.shape
    targets = jnp.asarray(targets, dtype=jnp.int32).reshape(-1)

    # ---- uniform-alpha specialization (the torch.ones default) -------------
    uniform_alpha = None
    alpha_arr = None
    if alpha is None:
        uniform_alpha = 1.0
    elif isinstance(alpha, (int, float)):
        uniform_alpha = float(alpha)
    else:
        alpha_arr = jnp.asarray(alpha, dtype=jnp.float32).reshape(-1)
        try:  # only possible when alpha is concrete (not a tracer)
            a_host = np.asarray(jax.device_get(alpha_arr))
            if a_host.size > 0 and np.all(a_host == a_host.flat[0]):
                uniform_alpha = float(a_host.flat[0])
                alpha_arr = None
        except Exception:
            pass

    vmem_limit, tile_budget = _vmem_budgets()
    P = _NUM_CORE_SPLITS

    compiler_params = pltpu.CompilerParams(
        dimension_semantics=("parallel", "arbitrary"),
        vmem_limit_bytes=vmem_limit,
    )

    if c <= _LANE:
        # ---- lane-dense path: rows on lanes, classes on sublanes ----------
        lane_cap = max(_LANE,
                       min(_LANE_TILE_CAP,
                           (tile_budget // (4 * c)) // _LANE * _LANE))
        desired_tiles = max(1, _cdiv(n, lane_cap))
        total_tiles = P * max(1, _cdiv(desired_tiles, P))
        tile_n = _round_up(_cdiv(n, total_tiles), _LANE)
        tpc = total_tiles // P
        n_pad = total_tiles * tile_n

        # Single fused transpose+pad copy; native dtype (no f32 upcast here).
        xT = jnp.pad(logits.T, ((0, 0), (0, n_pad - n)))
        tgt = jnp.pad(targets, (0, n_pad - n)).reshape(1, n_pad)

        in_specs = [
            pl.BlockSpec((c, tile_n), lambda p_, i_: (0, p_ * tpc + i_)),
            pl.BlockSpec((1, tile_n), lambda p_, i_: (0, p_ * tpc + i_)),
        ]
        args = [xT, tgt]
        if uniform_alpha is None:
            in_specs.append(pl.BlockSpec((c, 1), lambda p_, i_: (0, 0)))
            args.append(alpha_arr.reshape(c, 1))

        kernel = functools.partial(
            _focal_loss_kernel_lane, gamma=float(gamma), n_total=n,
            tile_n=tile_n, tiles_per_core=tpc, alpha_scalar=uniform_alpha)

        partials = pl.pallas_call(
            kernel,
            out_shape=jax.ShapeDtypeStruct((P, 1, 1), jnp.float32),
            grid=(P, tpc),
            in_specs=in_specs,
            out_specs=pl.BlockSpec((1, 1, 1), lambda p_, i_: (p_, 0, 0)),
            compiler_params=compiler_params,
        )(*args)
    else:
        # ---- row-major path: classes on lanes (wide C) ---------------------
        rows_cap = max(_SUBLANE,
                       min(8192,
                           (tile_budget // (4 * c)) // _SUBLANE * _SUBLANE))
        desired_tiles = max(1, _cdiv(n, rows_cap))
        total_tiles = P * max(1, _cdiv(desired_tiles, P))
        tile_n = _round_up(_cdiv(n, total_tiles), _SUBLANE)
        tpc = total_tiles // P
        n_pad = total_tiles * tile_n

        x_p = jnp.pad(logits, ((0, n_pad - n), (0, 0)))      # native dtype
        tgt = jnp.pad(targets, (0, n_pad - n)).reshape(n_pad, 1)

        in_specs = [
            pl.BlockSpec((tile_n, c), lambda p_, i_: (p_ * tpc + i_, 0)),
            pl.BlockSpec((tile_n, 1), lambda p_, i_: (p_ * tpc + i_, 0)),
        ]
        args = [x_p, tgt]
        if uniform_alpha is None:
            in_specs.append(pl.BlockSpec((1, c), lambda p_, i_: (0, 0)))
            args.append(alpha_arr.reshape(1, c))

        kernel = functools.partial(
            _focal_loss_kernel_row, gamma=float(gamma), n_total=n,
            tile_n=tile_n, tiles_per_core=tpc, alpha_scalar=uniform_alpha)

        partials = pl.pallas_call(
            kernel,
            out_shape=jax.ShapeDtypeStruct((P, 1, 1), jnp.float32),
            grid=(P, tpc),
            in_specs=in_specs,
            out_specs=pl.BlockSpec((1, 1, 1), lambda p_, i_: (p_, 0, 0)),
            compiler_params=compiler_params,
        )(*args)

    total = jnp.sum(partials)                 # combine per-core partial sums
    if size_average:
        total = total / jnp.float32(n)        # mean done outside the kernel
    return total


# ---------------------------------------------------------------------------
# Pure-JAX reference mirroring the PyTorch module
# ---------------------------------------------------------------------------
def focal_loss_ref(logits, targets, alpha=None, gamma=2.0, size_average=True):
    n, c = logits.shape
    if alpha is None:
        alpha = jnp.ones((c,), dtype=jnp.float32)
    p = jax.nn.softmax(logits.astype(jnp.float32), axis=1)
    mask = jax.nn.one_hot(targets, c, dtype=jnp.float32)
    probs = jnp.sum(p * mask, axis=1, keepdims=True)
    alpha_t = jnp.asarray(alpha, jnp.float32).reshape(-1)[targets].reshape(-1, 1)
    batch_loss = -alpha_t * (1.0 - probs) ** gamma * jnp.log(probs)
    return jnp.mean(batch_loss) if size_average else jnp.sum(batch_loss)


if __name__ == "__main__":
    key = jax.random.PRNGKey(0)
    k1, k2, k3, k4, k5, k6 = jax.random.split(key, 6)

    # ---- small class count (lane-dense path), class_num = 4 ----------------
    N, C = 8, 4
    logits = jax.random.normal(k1, (N, C), dtype=jnp.float32)
    targets = jax.random.randint(k2, (N,), 0, C, dtype=jnp.int32)
    alpha = jnp.ones((C,), dtype=jnp.float32)   # torch.ones(class_num, 1)

    loss = jax.block_until_ready(
        focal_loss(logits, targets, alpha=alpha, gamma=2.0, size_average=True))
    ref = focal_loss_ref(logits, targets, alpha=alpha, gamma=2.0,
                         size_average=True)
    assert jnp.allclose(loss, ref, rtol=1e-5, atol=1e-6), (loss, ref)

    loss_sum = jax.block_until_ready(
        focal_loss(logits, targets, alpha=alpha, gamma=2.0, size_average=False))
    ref_sum = focal_loss_ref(logits, targets, alpha=alpha, gamma=2.0,
                             size_average=False)
    assert jnp.allclose(loss_sum, ref_sum, rtol=1e-5, atol=1e-5), (loss_sum,
                                                                   ref_sum)

    # ---- non-uniform alpha (exercises the alpha input path) ----------------
    alpha_nu = jnp.array([0.25, 0.75, 0.5, 1.0], dtype=jnp.float32)
    loss_nu = jax.block_until_ready(
        focal_loss(logits, targets, alpha=alpha_nu, gamma=2.0,
                   size_average=True))
    ref_nu = focal_loss_ref(logits, targets, alpha=alpha_nu, gamma=2.0,
                            size_average=True)
    assert jnp.allclose(loss_nu, ref_nu, rtol=1e-5, atol=1e-6), (loss_nu,
                                                                 ref_nu)

    # ---- multi-tile lane-dense case (both core partitions + row masking) ---
    N2, C2 = 2500, 4
    logits2 = jax.random.normal(k3, (N2, C2), dtype=jnp.float32)
    targets2 = jax.random.randint(k4, (N2,), 0, C2, dtype=jnp.int32)
    loss2 = jax.block_until_ready(
        focal_loss(logits2, targets2, alpha=None, gamma=2.0, size_average=True))
    ref2 = focal_loss_ref(logits2, targets2, alpha=None, gamma=2.0,
                          size_average=True)
    assert jnp.allclose(loss2, ref2, rtol=1e-5, atol=1e-6), (loss2, ref2)

    # ---- native bf16 input (no wrapper upcast; kernel casts per-tile) ------
    logits_bf = logits2.astype(jnp.bfloat16)
    loss_bf = jax.block_until_ready(
        focal_loss(logits_bf, targets2, alpha=None, gamma=2.0,
                   size_average=True))
    ref_bf = focal_loss_ref(logits_bf, targets2, alpha=None, gamma=2.0,
                            size_average=True)
    assert jnp.allclose(loss_bf, ref_bf, rtol=1e-4, atol=1e-5), (loss_bf,
                                                                 ref_bf)

    # ---- wide class count (row-major path), uniform & non-uniform alpha ----
    N3, C3 = 300, 256
    logits3 = jax.random.normal(k5, (N3, C3), dtype=jnp.float32)
    targets3 = jax.random.randint(k6, (N3,), 0, C3, dtype=jnp.int32)
    loss3 = jax.block_until_ready(
        focal_loss(logits3, targets3, alpha=None, gamma=2.0, size_average=True))
    ref3 = focal_loss_ref(logits3, targets3, alpha=None, gamma=2.0,
                          size_average=True)
    assert jnp.allclose(loss3, ref3, rtol=1e-5, atol=1e-6), (loss3, ref3)

    alpha3 = jnp.linspace(0.1, 1.0, C3, dtype=jnp.float32)
    loss3a = jax.block_until_ready(
        focal_loss(logits3, targets3, alpha=alpha3, gamma=2.0,
                   size_average=True))
    ref3a = focal_loss_ref(logits3, targets3, alpha=alpha3, gamma=2.0,
                           size_average=True)
    assert jnp.allclose(loss3a, ref3a, rtol=1e-5, atol=1e-6), (loss3a, ref3a)

    print("KERNEL_OK")
</pallas_src>

<mosaic_0001>
module attributes {stable_mosaic.version = 11 : i64} {
  func.func @_focal_loss_kernel_lane(%arg0: i32, %arg1: i32, %arg2: memref<4x128xf32, #tpu.memory_space<vmem>>, %arg3: memref<1x128xi32, #tpu.memory_space<vmem>>, %arg4: memref<1x1x1xf32, #tpu.memory_space<vmem>>) attributes {dimension_semantics = [#tpu.dimension_semantics<parallel>, #tpu.dimension_semantics<arbitrary>], iteration_bounds = array<i64: 2, 1>, scalar_prefetch = 0 : i64, scratch_operands = 0 : i64, tpu.core_type = #tpu.core_type<tc>, window_params = [{transform_indices = @transform_0, window_bounds = array<i64: 4, 128>}, {transform_indices = @transform_1, window_bounds = array<i64: 1, 128>}, {transform_indices = @transform_2, window_bounds = array<i64: 1, 1, 1>}]} {
    %c0 = arith.constant 0 : index
    %c0_0 = arith.constant 0 : index
    %0 = vector.load %arg2[%c0, %c0_0] : memref<4x128xf32, #tpu.memory_space<vmem>>, vector<4x128xf32>
    %c0_1 = arith.constant 0 : index
    %c0_2 = arith.constant 0 : index
    %1 = vector.load %arg3[%c0_1, %c0_2] : memref<1x128xi32, #tpu.memory_space<vmem>>, vector<1x128xi32>
    %cst = arith.constant dense<0xFF800000> : vector<128xf32>
    %2 = vector.multi_reduction <maximumf>, %0, %cst [0] : vector<4x128xf32> to vector<128xf32>
    %3 = vector.shape_cast %2 : vector<128xf32> to vector<1x128xf32>
    %4 = vector.broadcast %3 : vector<1x128xf32> to vector<4x128xf32>
    %5 = arith.subf %0, %4 : vector<4x128xf32>
    %6 = math.exp %5 : vector<4x128xf32>
    %cst_3 = arith.constant dense<0.000000e+00> : vector<128xf32>
    %7 = vector.multi_reduction <add>, %6, %cst_3 [0] : vector<4x128xf32> to vector<128xf32>
    %8 = vector.shape_cast %7 : vector<128xf32> to vector<1x128xf32>
    %9 = tpu.iota {dimensions = array<i32: 0>} : vector<4x128xi32>
    %10 = vector.broadcast %1 : vector<1x128xi32> to vector<4x128xi32>
    %11 = arith.cmpi eq, %9, %10 : vector<4x128xi32>
    %12 = arith.extui %11 : vector<4x128xi1> to vector<4x128xi32>
    %13 = arith.sitofp %12 : vector<4x128xi32> to vector<4x128xf32>
    %14 = arith.mulf %0, %13 : vector<4x128xf32>
    %cst_4 = arith.constant dense<0.000000e+00> : vector<128xf32>
    %15 = vector.multi_reduction <add>, %14, %cst_4 [0] : vector<4x128xf32> to vector<128xf32>
    %16 = vector.shape_cast %15 : vector<128xf32> to vector<1x128xf32>
    %17 = arith.subf %16, %3 : vector<1x128xf32>
    %18 = math.log %8 : vector<1x128xf32>
    %19 = arith.subf %17, %18 : vector<1x128xf32>
    %20 = math.exp %19 : vector<1x128xf32>
    %cst_5 = arith.constant 1.000000e+00 : f32
    %21 = vector.broadcast %cst_5 : f32 to vector<1x128xf32>
    %22 = arith.subf %21, %20 : vector<1x128xf32>
    %23 = arith.mulf %22, %22 : vector<1x128xf32>
    %cst_6 = arith.constant -1.000000e+00 : f32
    %24 = vector.broadcast %cst_6 : f32 to vector<1x128xf32>
    %25 = arith.mulf %24, %23 : vector<1x128xf32>
    %26 = arith.mulf %25, %19 : vector<1x128xf32>
    %27 = tpu.iota {dimensions = array<i32: 1>} : vector<1x128xi32>
    %c1_i32 = arith.constant 1 : i32
    %28 = arith.muli %arg0, %c1_i32 : i32
    %29 = arith.addi %28, %arg1 : i32
    %c128_i32 = arith.constant 128 : i32
    %30 = arith.muli %29, %c128_i32 : i32
    %31 = vector.broadcast %30 : i32 to vector<1x128xi32>
    %32 = arith.addi %31, %27 : vector<1x128xi32>
    %c8_i32 = arith.constant 8 : i32
    %33 = vector.broadcast %c8_i32 : i32 to vector<1x128xi32>
    %34 = arith.cmpi slt, %32, %33 : vector<1x128xi32>
    %35 = arith.extui %34 : vector<1x128xi1> to vector<1x128xi32>
    %36 = arith.sitofp %35 : vector<1x128xi32> to vector<1x128xf32>
    %37 = arith.mulf %26, %36 : vector<1x128xf32>
    %38 = vector.shape_cast %37 : vector<1x128xf32> to vector<1x1x128xf32>
    %cst_7 = arith.constant dense<0.000000e+00> : vector<1xf32>
    %39 = vector.multi_reduction <add>, %38, %cst_7 [1, 2] : vector<1x1x128xf32> to vector<1xf32>
    %40 = vector.shape_cast %39 : vector<1xf32> to vector<1x1x1xf32>
    %41 = vector.extract %40[0, 0, 0] : f32 from vector<1x1x1xf32>
    %c0_i32 = arith.constant 0 : i32
    %42 = arith.cmpi eq, %arg1, %c0_i32 : i32
    %43 = arith.extui %42 : i1 to i32
    %c0_i32_8 = arith.constant 0 : i32
    %44 = arith.cmpi ne, %43, %c0_i32_8 : i32
    scf.if %44 {
      %cst_15 = arith.constant 0.000000e+00 : f32
      %49 = vector.broadcast %cst_15 : f32 to vector<1x1x1xf32>
      %c0_16 = arith.constant 0 : index
      %c0_17 = arith.constant 0 : index
      %c0_18 = arith.constant 0 : index
      %50 = vector.load %arg4[%c0_16, %c0_17, %c0_18] : memref<1x1x1xf32, #tpu.memory_space<vmem>>, vector<1x1x1xf32>
      tpu.vector_store %arg4[%c0_16, %c0_17, %c0_18], %49 {strides = array<i32>} : memref<1x1x1xf32, #tpu.memory_space<vmem>>, vector<1x1x1xf32>,
    } else {
    }
    %c0_9 = arith.constant 0 : index
    %c0_10 = arith.constant 0 : index
    %c0_11 = arith.constant 0 : index
    %45 = vector.load %arg4[%c0_9, %c0_10, %c0_11] : memref<1x1x1xf32, #tpu.memory_space<vmem>>, vector<1x1x1xf32>
    %46 = vector.broadcast %41 : f32 to vector<1x1x1xf32>
    %47 = arith.addf %45, %46 : vector<1x1x1xf32>
    %c0_12 = arith.constant 0 : index
    %c0_13 = arith.constant 0 : index
    %c0_14 = arith.constant 0 : index
    %48 = vector.load %arg4[%c0_12, %c0_13, %c0_14] : memref<1x1x1xf32, #tpu.memory_space<vmem>>, vector<1x1x1xf32>
    tpu.vector_store %arg4[%c0_12, %c0_13, %c0_14], %47 {strides = array<i32>} : memref<1x1x1xf32, #tpu.memory_space<vmem>>, vector<1x1x1xf32>,
    return
  }
  func.func @transform_0(%arg0: i32, %arg1: i32) -> (i32, i32) {
    %c1_i32 = arith.constant 1 : i32
    %0 = arith.muli %arg0, %c1_i32 : i32
    %1 = arith.addi %0, %arg1 : i32
    %c0_i32 = arith.constant 0 : i32
    %c0_i32_0 = arith.constant 0 : i32
    return %c0_i32, %1 : i32, i32
  }
  func.func @transform_1(%arg0: i32, %arg1: i32) -> (i32, i32) {
    %c1_i32 = arith.constant 1 : i32
    %0 = arith.muli %arg0, %c1_i32 : i32
    %1 = arith.addi %0, %arg1 : i32
    %c0_i32 = arith.constant 0 : i32
    %c0_i32_0 = arith.constant 0 : i32
    return %c0_i32, %1 : i32, i32
  }
  func.func @transform_2(%arg0: i32, %arg1: i32) -> (i32, i32, i32) {
    %c0_i32 = arith.constant 0 : i32
    %c0_i32_0 = arith.constant 0 : i32
    %c0_i32_1 = arith.constant 0 : i32
    return %arg0, %c0_i32, %c0_i32_0 : i32, i32, i32
  }
}

</mosaic_0001>

<bundles_post_ra>
// kernel: tpu_custom_call.1
= control target key start
LH: loop header
LB: loop body
LE: loop exit
PB: predicated region body
PF: predicated region fallthrough
CT: control target
= control target key end

     0   :  { %7 = vsyncpa [#allocation3], 0  ;;  %s663_s0 = inlined_call_operand.hbm [shape: f32[4,256], index: 0, kind: input, shape index: {}]   ;;  %s664_s1 = inlined_call_operand.vmem [shape: s32[1,256], index: 1, kind: input, shape index: {}]   ;;  %s665_s2 = inlined_call_operand.vmem [shape: f32[2,1,1], index: 2, kind: output, shape index: {}]  }
   0x1   :  { %9 = vsyncpa [#allocation3 + $0x1], 0  ;;  %s527_s9 = smov 0   ;;  %s529_s10 = smov 0  }
   0x2   :  { %s531_s11 = smov 0   ;;  %s533_s12 = smov 0  }
   0x3   :  { %s535_s13 = smov 0   ;;  %s537_s14 = smov 0  }
   0x4 LB: > { %s350_s15 = sadd.s32 4294967295, %s508_s14   ;;  %s27_s16 = sadd.s32 1, %s504_s13  ;;  %s508_s14 = sphi %s537_s14, %s15_s14   ;;  %s504_s13 = sphi %s535_s13, %s675_s13   ;;  %s500_s12 = sphi %s533_s12, %s674_s12   ;;  %s496_s11 = sphi %s531_s11, %s673_s11   ;;  %s492_s10 = sphi %s529_s10, %s672_s10   ;;  %s488_s9 = sphi %s527_s9, %s671_s9  }
   0x5   : > { %p29_p0 = scmp.ge.s32.totalorder %s27_s16, 2  ;;  %s36_s17 = sadd.s32 1, %s496_s11 }
   0x6   : > { %p43_p1 = scmp.ne.s32.totalorder %s496_s11, %s492_s10  ;;  %p44_p2 = scmp.eq.s32.totalorder %s508_s14, 0 }
   0x7   : > { %s677_s16 = smov (%p29_p0, %s27_s16), 0  ;;  %p49_p4 = scmp.ne.s32.totalorder %s492_s10, %s488_s9 }
   0x8   : > { %p563_p3 = por %p44_p2, %p43_p1  ;;  %s33_s19 = ssub.s32 %s504_s13, %s677_s16 }
   0x9   : > { %p50_p5 = scmp.eq.s32.totalorder %s350_s15, 0  ;;  %p34_p6 = scmp.eq.s32.totalorder %s33_s19, 0 }
   0xa   : > { %p372_p8 = scmp.lt.s32.totalorder %s508_s14, 2  ;;  %s127_s22 = sand.u32 1, %s496_s11  }
   0xb   : > { %p570_p7 = por %p50_p5, %p49_p4  ;;  %s355_s23 = sshll.u32 %s504_s13, 6 }
   0xc   : > { %s576_s21 = scalar_select %p34_p6, %s496_s11, %s36_s17  }
   0xd   : > { %s354_s24 = sshll.u32 %s127_s22, 2  ;;  %s583_s27 = scalar_lea.hbm %s663_s0, %s355_s23 }
   0xe   : > { %s131_s28 = scalar_lea.vmem [#allocation2], %s354_s24  ;;  %p587_p9 = pnand %p372_p8, %p563_p3 }
   0xf   : > { %s139_s29 = sshll.u32 %s131_s28, 4  ;;  %s128_s3 = scalar_lea.sflag [#allocation3], %s127_s22  ;;  %s591_s29 = int_to_ptr.vmem [resolvable:$true] %s139_s29 }
  0x10   : > { %s428_s4 = scalar_lea.hbm %s583_s27, 64  ;;  %p430_p13 = pneg %p587_p9 }
  0x11   : > { %p429_p12 = scmp.ne.s32.totalorder %s583_s27, %s428_s4  ;;  %s433_s7 = scalar_lea.hbm %s663_s0, 128 }
  0x12   : > { %p434_p2 = scmp.lt.u32.totalorder %s583_s27, %s663_s0  ;;  %p435_p3 = scmp.lt.u32.totalorder %s433_s7, %s428_s4 }
  0x13   : > { %p431_p0 = pnand %p430_p13, %p429_p12  ;;  %p437_p5 = scmp.lt.u32.totalorder %s428_s4, %s583_s27 }
  0x14   : > { %p436_p4 = por %p435_p3, %p434_p2 }
  0x15   : > { %p432_p1 = pneg %p431_p0 }
  0x16   : > { %p438_p6 = por %p437_p5, %p436_p4 }
  0x18   : > { %p439_p8 = pnand %p438_p6, %p432_p1 }
  0x1a   : > { %442 = shalt.err (!%p439_p8)
}
  0x1b   : > { %s443_s15 = scalar_lea.vmem %s591_s29, 64  ;;  %s510_s17 = smov [#allocation2]  }
  0x1c   : > { %p444_p12 = scmp.ne.s32.totalorder %s591_s29, %s443_s15  ;;  %s448_s18 = sshll.u32 %s510_s17, 4  ;;  %s449_s18 = int_to_ptr.vmem [resolvable:$false] %s448_s18 }
  0x1d   : > { %s450_s19 = scalar_lea.vmem %s449_s18, 128  ;;  %p451_p11 = scmp.lt.s32.totalorder %s591_s29, %s449_s18 }
  0x1e   : > { %p446_p0 = pnand %p444_p12, %p430_p13  ;;  %p452_p2 = scmp.lt.s32.totalorder %s450_s19, %s443_s15 }
  0x20   : > { %p447_p10 = pneg %p446_p0  ;;  %p453_p3 = por %p452_p2, %p451_p11 }
  0x22   : > { %p454_p4 = pnand %p453_p3, %p447_p10 }
  0x24   : > { %457 = shalt.err (!%p454_p4)
}
  0x25   : > { %371 = dma.hbm_to_vmem [thread:$0]  (!%p587_p9), %s583_s27, 64, %s591_s29, %s128_s3  }
  0x26   : > { %p669_p1 = scmp.lt.s32.totalorder %s508_s14, 3  ;;  %p670_p5 = scmp.ge.s32.totalorder %s508_s14, 1 }
  0x28   : > { %p153_p13 = pnand %p670_p5, %p669_p1 }
  0x29   : > { %s158_s22 = sand.u32 (!%p153_p13), 1, %s492_s10  }
  0x2a   : > { %156 = sbr.rel (%p153_p13) target bundleno = 339 (0x153), region = 28  ;;  %s357_s23 = sshll.u32 (!%p153_p13), %s158_s22, 2 }
  0x2b   : > { %s159_s24 = scalar_lea.sflag (!%p153_p13), [#allocation3], %s158_s22  ;;  %s162_s25 = scalar_lea.vmem (!%p153_p13), [#allocation2], %s357_s23 }
  0x31   : > { %483 = dma.done.wait (%p570_p7), %s159_s24, 64  }
  0x32   : > { %485 = vsyncadd (%p570_p7), %s159_s24, 4294967232  ;;  %vm196_vm0 = vcmask 1043456   ;;  %p187_p10 = scmp.lt.s32.totalorder %s500_s12, 1  ;;  %v194_v0 = vld [vmem:[%s162_s25] sm:$0xf]  ;;  %v214_v5 = vlaneseq  ;;  %v511_v13 = vmov 0.0  }
  0x33   : > { %v197_v1 = vsel %vm196_vm0, %v194_v0, -inf  ;;  %s360_s20 = sshll.u32 %s500_s12, 7  ;;  %vm251_vm3 = vcmask 1040384   ;;  %vm266_vm4 = vcmask 0  }
  0x34   : > { %v198_v2 = vrot.slane %v197_v1, 4  ;;  %s632_s26 = scalar_select %p187_p10, %s500_s12, 1  ;;  %v215_v8 = vshrl.u32 %v214_v5, 7  ;;  %v242_v36 = vand.u32 127, %v214_v5  ;;  %v245_v37 = vstv %s360_s20 }
  0x36   : > { %v199_v3 = vmax.f32 %v197_v1, %v198_v2  ;;  %s189_s29 = scalar_lea.vmem %s664_s1, %s632_s26  ;;  %v246_v38 = vadd.s32 %v245_v37, %v242_v36  ;;  %s193_s4 = scalar_lea.vmem %s665_s2, %s632_s26 }
  0x37   : > { %v358_v9 = vld [vmem:[%s189_s29] ss:$0 sm:$0xff]  ;;  %267 = vst.msk [vmem:[%s193_s4] sm:$0x1] %vm266_vm4, %v511_v13 }
  0x38   : > { %v200_v4 = vrot.slane %v199_v3, 2  ;;  %vm220_vm1 = vcmp.eq.s32.totalorder %v215_v8, %v358_v9  ;;  %vm247_vm2 = vcmp.lt.s32.totalorder %v246_v38, 8 }
  0x39   : > { %v359_v14 = vsel %vm220_vm1, 1.0, %v511_v13  ;;  %v361_v43 = vsel %vm247_vm2, 1.0, %v511_v13 }
  0x3a   : > { %v201_v6 = vmax.f32 %v199_v3, %v200_v4  ;;  %v223_v15 = vmul.f32 %v359_v14, %v194_v0 }
  0x3c   : > { %v202_v7 = vrot.slane %v201_v6, 1  ;;  %v224_v16 = vsel %vm196_vm0, %v223_v15, 0.0 }
  0x3d   : > { %v225_v17 = vrot.slane %v224_v16, 4 }
  0x3e   : > { %v203_v10 = vmax.f32 %v201_v6, %v202_v7  ;;  %v268_v54 = vld [vmem:[%s193_s4] sm:$0x1] }
  0x3f   : > { %v226_v21 = vadd.f32 %v225_v17, %v224_v16 }
  0x40   : > { %v204_v11 = vsub.f32 %v194_v0, %v203_v10 }
  0x41   : > { %v227_v24 = vrot.slane %v226_v21, 2 }
  0x42   : > { %v205_v12 = vmul.f32 1.442695, %v204_v11 }
  0x43   : > { %v228_v27 = vadd.f32 %v227_v24, %v226_v21 }
  0x44   : > { %422 = vpow2.f32 %v205_v12 }
  0x45   : > { %v229_v29 = vrot.slane %v228_v27, 1 }
  0x47   : > { %v230_v30 = vadd.f32 %v229_v29, %v228_v27 }
  0x49   : > { %v231_v31 = vsub.f32 %v230_v30, %v203_v10 }
  0x4e   : > { %v423_v18 = vpop.eup %422 }
  0x4f   : > { %v207_v19 = vsel %vm196_vm0, %v423_v18, 0.0 }
  0x50   : > { %v208_v20 = vrot.slane %v207_v19, 4 }
  0x52   : > { %v209_v22 = vadd.f32 %v208_v20, %v207_v19 }
  0x54   : > { %v210_v23 = vrot.slane %v209_v22, 2 }
  0x56   : > { %v211_v25 = vadd.f32 %v210_v23, %v209_v22 }
  0x58   : > { %v212_v26 = vrot.slane %v211_v25, 1 }
  0x5a   : > { %v213_v28 = vadd.f32 %v212_v26, %v211_v25 }
  0x5c   : > { %424 = vlog2.f32 %v213_v28 }
  0x66   : > { %v425_v32 = vpop.eup %424 }
  0x67   : > { %v233_v33 = vmul.f32 0.6931472, %v425_v32 }
  0x69   : > { %v234_v34 = vsub.f32 %v231_v31, %v233_v33 }
  0x6b   : > { %v235_v35 = vmul.f32 1.442695, %v234_v34 }
  0x6d   : > { %426 = vpow2.f32 %v235_v35 }
  0x77   : > { %v427_v39 = vpop.eup %426 }
  0x78   : > { %v237_v40 = vsub.f32 1.0, %v427_v39 }
  0x7a   : > { %v238_v41 = vmul.f32 %v237_v40, %v237_v40 }
  0x7c   : > { %v239_v42 = vmul.f32 -1.0, %v238_v41 }
  0x7e   : > { %v240_v44 = vmul.f32 %v239_v42, %v234_v34 }
  0x80   : > { %v250_v45 = vmul.f32 %v361_v43, %v240_v44 }
  0x82   : > { %v252_v46 = vsel %vm251_vm3, %v250_v45, 0.0 }
  0x83   : > { %253 = vadd.xlane.f32.xlu0 %v252_v46 }
 0x110   : > { %v254_v47 = vpop.xlane.xlu0 %253 }
 0x111   : > { %v255_v48 = vrot.slane %v254_v47, 4 }
 0x113   : > { %v256_v49 = vadd.f32 %v255_v48, %v254_v47 }
 0x115   : > { %v257_v50 = vrot.slane %v256_v49, 2 }
 0x117   : > { %v258_v51 = vadd.f32 %v257_v50, %v256_v49 }
 0x119   : > { %v259_v52 = vrot.slane %v258_v51, 1 }
 0x11b   : > { %v260_v53 = vadd.f32 %v259_v52, %v258_v51 }
 0x11d   : > { %364 = vpush %v260_v53 }
 0x14e   : > { %s365_s12 = spop %364 }
 0x14f   : > { %v269_v55 = vstv %s365_s12 }
 0x150   : > { %v270_v56 = vadd.f32 %v269_v55, %v268_v54 }
 0x152   : > { %272 = vst.msk [vmem:[%s193_s4] sm:$0x1] %vm266_vm4, %v270_v56 }
 0x153 PF: > { %s15_s14 = sadd.s32 1, %s508_s14   ;;  %s671_s9 = smov %s492_s10 }
 0x154   : > { %p12_p7 = scmp.ge.s32.totalorder %s15_s14, 4   ;;  %s672_s10 = smov %s496_s11 }
 0x155   : > { %s673_s11 = smov %s576_s21  ;;  %s674_s12 = smov %s504_s13 }
 0x156   : > { %s675_s13 = smov %s677_s16  ;;  %14 = sbr.rel (!%p12_p7) target bundleno = 4 (0x4), region = 75 }
 0x15d   :  { %290 = vsyncpa [#allocation3], 1 }
 0x15e   :  { %292 = vsyncpa [#allocation3 + $0x1], 1 }

</bundles_post_ra>
